<compile_context>
chip_gen: v7x
topology: tpu7x:2x2x1
jax: 0.10.0
libtpu: 0.0.40
codegen_flags: <defaults>
</compile_context>

<pallas_src>
import math

import jax
import jax.numpy as jnp
from jax.experimental import pallas as pl
from jax.experimental.pallas import tpu as pltpu


# Combined fixed-embedding table layout (embed_type='fixed', freq='h').
_MONTH, _DAY, _WEEKDAY, _HOUR = 13, 32, 7, 24
_OFFSETS = (0, _MONTH, _MONTH + _DAY, _MONTH + _DAY + _WEEKDAY)   # (0, 13, 45, 52)
_NTAB = _MONTH + _DAY + _WEEKDAY + _HOUR                          # 76
_NTAB_PAD = 128                                                   # lane-dense pad


def _sinusoid_table(n_rows, d_model):
    """Rows of the PyTorch FixedEmbedding sin/cos table."""
    pos = jnp.arange(n_rows, dtype=jnp.float32)[:, None]
    div = jnp.exp(jnp.arange(0, d_model, 2, dtype=jnp.float32)
                  * (-math.log(10000.0) / d_model))
    tab = jnp.zeros((n_rows, d_model), dtype=jnp.float32)
    tab = tab.at[:, 0::2].set(jnp.sin(pos * div))
    tab = tab.at[:, 1::2].set(jnp.cos(pos * div))
    return tab


def make_temporal_table(d_model):
    """Concatenated [month | day | weekday | hour] tables, zero-padded to 128 rows."""
    tabs = [_sinusoid_table(n, d_model) for n in (_MONTH, _DAY, _WEEKDAY, _HOUR)]
    tab = jnp.concatenate(tabs, axis=0)                        # (76, d_model)
    return jnp.pad(tab, ((0, _NTAB_PAD - _NTAB), (0, 0)))      # (128, d_model)


def _embed_kernel(xs_ref, xm_ref, w_ref, tab_ref, o_ref):
    # xs_ref : (1, TS, Kp)  f32  stacked [x_{t-1} | x_t | x_{t+1}] channels (zero-padded)
    # xm_ref : (1, TS, 4)   i32  time-feature ids, pre-offset into the combined table
    # w_ref  : (Kp, D)      f32  flattened circular-conv weight
    # tab_ref: (128, D)     f32  concatenated fixed sin/cos tables (zero-padded rows)
    # o_ref  : (1, TS, D)   f32
    ts = o_ref.shape[1]
    ntab = tab_ref.shape[0]

    # TokenEmbedding: circular Conv1d(k=3) == single MXU matmul.
    val = jnp.dot(xs_ref[0], w_ref[...], preferred_element_type=jnp.float32)

    # TemporalEmbedding: sum of 4 fixed-table lookups == multi-hot @ table (MXU).
    ids = xm_ref[0]                                            # (TS, 4) int32
    col = jax.lax.broadcasted_iota(jnp.int32, (ts, ntab), 1)
    onehot = (col == ids[:, 0:1]).astype(jnp.float32)
    for f in range(1, ids.shape[1]):                           # static 4-wide loop (VPU)
        onehot = onehot + (col == ids[:, f:f + 1]).astype(jnp.float32)
    temp = jnp.dot(onehot, tab_ref[...], preferred_element_type=jnp.float32)

    # Dropout: eval-mode identity.
    # TODO(synk): stochastic training-mode dropout (needs PRNG seed plumbing) omitted.
    o_ref[0] = (val + temp).astype(o_ref.dtype)


def data_embedding_wo_pos(x, x_mark, conv_w, temporal_table, *, seq_tile=512):
    """Forward of DataEmbedding_wo_pos (embed_type='fixed', freq='h', eval mode).

    x:              (B, L, c_in)      float32
    x_mark:         (B, L, >=4) int   columns [month, day, weekday, hour, ...]
    conv_w:         (d_model, c_in, 3)  Conv1d weight (PyTorch layout), bias=False
    temporal_table: (128, d_model)    from make_temporal_table
    """
    B, L, C = x.shape
    d_model = conv_w.shape[0]

    # Circular-conv operands: stack the three shifted copies along channels so the
    # kernel-size-3 conv collapses to one matmul with K = 3 * c_in.
    x_stacked = jnp.concatenate(
        [jnp.roll(x, 1, axis=1), x, jnp.roll(x, -1, axis=1)], axis=-1)        # (B, L, 3C)
    w_flat = jnp.concatenate([conv_w[:, :, k].T for k in range(3)], axis=0)   # (3C, D)

    k = 3 * C
    k_pad = max(8, ((k + 7) // 8) * 8)
    if k_pad != k:
        x_stacked = jnp.pad(x_stacked, ((0, 0), (0, 0), (0, k_pad - k)))
        w_flat = jnp.pad(w_flat, ((0, k_pad - k), (0, 0)))

    # Offset the 4 time-feature columns into the combined table's row space.
    offs = jnp.asarray(_OFFSETS, dtype=jnp.int32)
    ids = x_mark[..., :4].astype(jnp.int32) + offs                            # (B, L, 4)

    ts = L if L <= seq_tile else seq_tile       # full seq, or a multiple-of-8 tile
    n_seq = pl.cdiv(L, ts)

    return pl.pallas_call(
        _embed_kernel,
        out_shape=jax.ShapeDtypeStruct((B, L, d_model), jnp.float32),
        grid=(B, n_seq),
        in_specs=[
            pl.BlockSpec((1, ts, k_pad), lambda b, i: (b, i, 0)),
            pl.BlockSpec((1, ts, 4), lambda b, i: (b, i, 0)),
            pl.BlockSpec((k_pad, d_model), lambda b, i: (0, 0)),        # resident weight
            pl.BlockSpec((_NTAB_PAD, d_model), lambda b, i: (0, 0)),    # resident table
        ],
        out_specs=pl.BlockSpec((1, ts, d_model), lambda b, i: (b, i, 0)),
        compiler_params=pltpu.CompilerParams(
            dimension_semantics=("parallel", "parallel")),
    )(x_stacked, ids, w_flat, temporal_table)


def _reference(x, x_mark, conv_w, temporal_table):
    """Pure-JAX reference of the PyTorch forward (eval mode)."""
    W0, W1, W2 = conv_w[:, :, 0], conv_w[:, :, 1], conv_w[:, :, 2]
    val = (jnp.einsum('blc,dc->bld', jnp.roll(x, 1, axis=1), W0)
           + jnp.einsum('blc,dc->bld', x, W1)
           + jnp.einsum('blc,dc->bld', jnp.roll(x, -1, axis=1), W2))
    offs = jnp.asarray(_OFFSETS, dtype=jnp.int32)
    ids = x_mark[..., :4].astype(jnp.int32) + offs
    temp = temporal_table[ids].sum(axis=2)                    # (B, L, 4, D) -> (B, L, D)
    return val + temp


if __name__ == "__main__":
    B, L, C_IN, D_MODEL = 2, 16, 7, 32

    key = jax.random.PRNGKey(0)
    kx, kw, k0, k1, k2, k3 = jax.random.split(key, 6)

    x = jax.random.normal(kx, (B, L, C_IN), dtype=jnp.float32)
    x_mark = jnp.stack([
        jax.random.randint(k0, (B, L), 0, _MONTH),     # month
        jax.random.randint(k1, (B, L), 0, _DAY),       # day
        jax.random.randint(k2, (B, L), 0, _WEEKDAY),   # weekday
        jax.random.randint(k3, (B, L), 0, _HOUR),      # hour
    ], axis=-1).astype(jnp.int32)

    # Conv1d weight, kaiming-normal-style init (fan_in = c_in * kernel_size).
    conv_w = (jax.random.normal(kw, (D_MODEL, C_IN, 3), dtype=jnp.float32)
              * math.sqrt(2.0 / (C_IN * 3)))

    table = make_temporal_table(D_MODEL)

    out = data_embedding_wo_pos(x, x_mark, conv_w, table)
    out = jax.block_until_ready(out)

    ref = _reference(x, x_mark, conv_w, table)
    assert out.shape == (B, L, D_MODEL), out.shape
    max_err = float(jnp.max(jnp.abs(out - ref)))
    assert jnp.allclose(out, ref, atol=5e-2, rtol=5e-2), f"mismatch vs reference: {max_err}"

    print("KERNEL_OK")
</pallas_src>

<mosaic_0001>
module attributes {stable_mosaic.version = 11 : i64} {
  func.func @_embed_kernel(%arg0: i32, %arg1: i32, %arg2: memref<1x16x24xf32, #tpu.memory_space<vmem>>, %arg3: memref<1x16x4xi32, #tpu.memory_space<vmem>>, %arg4: memref<24x32xf32, #tpu.memory_space<vmem>>, %arg5: memref<128x32xf32, #tpu.memory_space<vmem>>, %arg6: memref<1x16x32xf32, #tpu.memory_space<vmem>>) attributes {dimension_semantics = [#tpu.dimension_semantics<parallel>, #tpu.dimension_semantics<parallel>], iteration_bounds = array<i64: 2, 1>, scalar_prefetch = 0 : i64, scratch_operands = 0 : i64, tpu.core_type = #tpu.core_type<tc>, window_params = [{transform_indices = @transform_0, window_bounds = array<i64: 1, 16, 24>}, {transform_indices = @transform_1, window_bounds = array<i64: 1, 16, 4>}, {pipeline_mode = #tpu.pipeline_mode<synchronous>, transform_indices = @transform_2, window_bounds = array<i64: 24, 32>}, {pipeline_mode = #tpu.pipeline_mode<synchronous>, transform_indices = @transform_3, window_bounds = array<i64: 128, 32>}, {transform_indices = @transform_4, window_bounds = array<i64: 1, 16, 32>}]} {
    %c0 = arith.constant 0 : index
    %c0_0 = arith.constant 0 : index
    %c0_1 = arith.constant 0 : index
    %0 = vector.load %arg2[%c0, %c0_0, %c0_1] : memref<1x16x24xf32, #tpu.memory_space<vmem>>, vector<1x16x24xf32>
    %1 = vector.shape_cast %0 : vector<1x16x24xf32> to vector<16x24xf32>
    %c0_2 = arith.constant 0 : index
    %c0_3 = arith.constant 0 : index
    %2 = vector.load %arg4[%c0_2, %c0_3] : memref<24x32xf32, #tpu.memory_space<vmem>>, vector<24x32xf32>
    %cst = arith.constant dense<0.000000e+00> : vector<16x32xf32>
    %3 = tpu.matmul %1, %2, %cst {dimension_numbers = #tpu.dot_dimension_numbers<[1], [0], [0], [1], [0, 0, 1, 1], [], []>} : vector<16x24xf32>, vector<24x32xf32>, vector<16x32xf32> -> vector<16x32xf32>
    %c0_4 = arith.constant 0 : index
    %c0_5 = arith.constant 0 : index
    %c0_6 = arith.constant 0 : index
    %4 = vector.load %arg3[%c0_4, %c0_5, %c0_6] : memref<1x16x4xi32, #tpu.memory_space<vmem>>, vector<1x16x4xi32>
    %5 = vector.shape_cast %4 : vector<1x16x4xi32> to vector<16x4xi32>
    %6 = tpu.iota {dimensions = array<i32: 1>} : vector<16x128xi32>
    %7 = vector.extract_strided_slice %5 {offsets = [0, 0], sizes = [16, 1], strides = [1, 1]} : vector<16x4xi32> to vector<16x1xi32>
    %8 = vector.broadcast %7 : vector<16x1xi32> to vector<16x128xi32>
    %9 = arith.cmpi eq, %6, %8 : vector<16x128xi32>
    %10 = arith.extui %9 : vector<16x128xi1> to vector<16x128xi32>
    %11 = arith.sitofp %10 : vector<16x128xi32> to vector<16x128xf32>
    %12 = vector.extract_strided_slice %5 {offsets = [0, 1], sizes = [16, 1], strides = [1, 1]} : vector<16x4xi32> to vector<16x1xi32>
    %13 = vector.broadcast %12 : vector<16x1xi32> to vector<16x128xi32>
    %14 = arith.cmpi eq, %6, %13 : vector<16x128xi32>
    %15 = arith.extui %14 : vector<16x128xi1> to vector<16x128xi32>
    %16 = arith.sitofp %15 : vector<16x128xi32> to vector<16x128xf32>
    %17 = arith.addf %11, %16 : vector<16x128xf32>
    %18 = vector.extract_strided_slice %5 {offsets = [0, 2], sizes = [16, 1], strides = [1, 1]} : vector<16x4xi32> to vector<16x1xi32>
    %19 = vector.broadcast %18 : vector<16x1xi32> to vector<16x128xi32>
    %20 = arith.cmpi eq, %6, %19 : vector<16x128xi32>
    %21 = arith.extui %20 : vector<16x128xi1> to vector<16x128xi32>
    %22 = arith.sitofp %21 : vector<16x128xi32> to vector<16x128xf32>
    %23 = arith.addf %17, %22 : vector<16x128xf32>
    %24 = vector.extract_strided_slice %5 {offsets = [0, 3], sizes = [16, 1], strides = [1, 1]} : vector<16x4xi32> to vector<16x1xi32>
    %25 = vector.broadcast %24 : vector<16x1xi32> to vector<16x128xi32>
    %26 = arith.cmpi eq, %6, %25 : vector<16x128xi32>
    %27 = arith.extui %26 : vector<16x128xi1> to vector<16x128xi32>
    %28 = arith.sitofp %27 : vector<16x128xi32> to vector<16x128xf32>
    %29 = arith.addf %23, %28 : vector<16x128xf32>
    %c0_7 = arith.constant 0 : index
    %c0_8 = arith.constant 0 : index
    %30 = vector.load %arg5[%c0_7, %c0_8] : memref<128x32xf32, #tpu.memory_space<vmem>>, vector<128x32xf32>
    %cst_9 = arith.constant dense<0.000000e+00> : vector<16x32xf32>
    %31 = tpu.matmul %29, %30, %cst_9 {dimension_numbers = #tpu.dot_dimension_numbers<[1], [0], [0], [1], [0, 0, 1, 1], [], []>} : vector<16x128xf32>, vector<128x32xf32>, vector<16x32xf32> -> vector<16x32xf32>
    %32 = arith.addf %3, %31 : vector<16x32xf32>
    %c0_10 = arith.constant 0 : index
    %c0_11 = arith.constant 0 : index
    %c0_12 = arith.constant 0 : index
    %33 = vector.load %arg6[%c0_10, %c0_11, %c0_12] : memref<1x16x32xf32, #tpu.memory_space<vmem>>, vector<1x16x32xf32>
    %34 = vector.shape_cast %33 : vector<1x16x32xf32> to vector<16x32xf32>
    %35 = vector.shape_cast %32 : vector<16x32xf32> to vector<1x16x32xf32>
    tpu.vector_store %arg6[%c0_10, %c0_11, %c0_12], %35 {strides = array<i32>} : memref<1x16x32xf32, #tpu.memory_space<vmem>>, vector<1x16x32xf32>,
    return
  }
  func.func @transform_0(%arg0: i32, %arg1: i32) -> (i32, i32, i32) {
    %c0_i32 = arith.constant 0 : i32
    %c0_i32_0 = arith.constant 0 : i32
    return %arg0, %arg1, %c0_i32 : i32, i32, i32
  }
  func.func @transform_1(%arg0: i32, %arg1: i32) -> (i32, i32, i32) {
    %c0_i32 = arith.constant 0 : i32
    %c0_i32_0 = arith.constant 0 : i32
    return %arg0, %arg1, %c0_i32 : i32, i32, i32
  }
  func.func @transform_2(%arg0: i32, %arg1: i32) -> (i32, i32) {
    %c0_i32 = arith.constant 0 : i32
    %c0_i32_0 = arith.constant 0 : i32
    %c0_i32_1 = arith.constant 0 : i32
    return %c0_i32, %c0_i32_0 : i32, i32
  }
  func.func @transform_3(%arg0: i32, %arg1: i32) -> (i32, i32) {
    %c0_i32 = arith.constant 0 : i32
    %c0_i32_0 = arith.constant 0 : i32
    %c0_i32_1 = arith.constant 0 : i32
    return %c0_i32, %c0_i32_0 : i32, i32
  }
  func.func @transform_4(%arg0: i32, %arg1: i32) -> (i32, i32, i32) {
    %c0_i32 = arith.constant 0 : i32
    %c0_i32_0 = arith.constant 0 : i32
    return %arg0, %arg1, %c0_i32 : i32, i32, i32
  }
}

</mosaic_0001>

<bundles_post_ra>
// kernel: tpu_custom_call.1
= control target key start
LH: loop header
LB: loop body
LE: loop exit
PB: predicated region body
PF: predicated region fallthrough
CT: control target
= control target key end

     0   :  { %9 = vsyncpa [#allocation3], 0  ;;  %s1113_s0 = inlined_call_operand.vmem [shape: f32[2,16,24], index: 0, kind: input, shape index: {}]   ;;  %s1114_s1 = inlined_call_operand.vmem [shape: s32[2,16,4], index: 1, kind: input, shape index: {}]   ;;  %s1115_s2 = inlined_call_operand.vmem [shape: f32[24,32], index: 2, kind: input, shape index: {}]   ;;  %s1116_s3 = inlined_call_operand.vmem [shape: f32[128,32], index: 3, kind: input, shape index: {}]   ;;  %s1117_s4 = inlined_call_operand.hbm [shape: f32[2,16,32], index: 4, kind: output, shape index: {}]  }
   0x1   :  { %11 = vsyncpa [#allocation3 + $0x1], 0  ;;  %s931_s15 = smov 0   ;;  %s933_s16 = smov 0  }
   0x2   :  { %s935_s17 = smov 0   ;;  %s937_s18 = smov 0  }
   0x3   :  { %s939_s19 = smov 0   ;;  %s941_s20 = smov 0  }
   0x4 LB: > { %s615_s21 = sadd.s32 4294967295, %s896_s20   ;;  %s616_s22 = sadd.s32 4294967294, %s896_s20   ;;  %s896_s20 = sphi %s941_s20, %s17_s20   ;;  %s892_s19 = sphi %s939_s19, %s1124_s19   ;;  %s888_s18 = sphi %s937_s18, %s1123_s18   ;;  %s884_s17 = sphi %s935_s17, %s1122_s17   ;;  %s880_s16 = sphi %s933_s16, %s1121_s16   ;;  %s876_s15 = sphi %s931_s15, %s1120_s15  }
   0x5   : > { %s29_s23 = sadd.s32 1, %s892_s19  ;;  %s136_s24 = sadd.s32 1, %s884_s17 }
   0x6   : > { %p31_p0 = scmp.ge.s32.totalorder %s29_s23, 2  ;;  %p146_p1 = scmp.ne.s32.totalorder %s884_s17, %s880_s16 }
   0x7   : > { %p147_p2 = scmp.eq.s32.totalorder %s615_s21, 1  ;;  %p152_p3 = scmp.ne.s32.totalorder %s880_s16, %s876_s15 }
   0x8   : > { %s1126_s23 = smov (%p31_p0, %s29_s23), 0  ;;  %p153_p5 = scmp.eq.s32.totalorder %s616_s22, 1 }
   0x9   : > { %p971_p4 = por %p147_p2, %p146_p1  ;;  %s131_s26 = ssub.s32 %s892_s19, %s1126_s23 }
   0xa   : > { %p619_p6 = scmp.ge.s32.totalorder %s896_s20, 1  ;;  %p134_p7 = scmp.eq.s32.totalorder %s131_s26, 0 }
   0xb   : > { %p978_p8 = por %p153_p5, %p152_p3  ;;  %p203_p9 = scmp.lt.s32.totalorder %s896_s20, 3 }
   0xc   : > { %s984_s28 = scalar_select %p134_p7, %s884_s17, %s136_s24  }
   0xd   : > { %p204_p10 = pnand %p619_p6, %p203_p9 }
   0xe   : > { %p243_p11 = scmp.lt.s32.totalorder (!%p204_p10), %s888_s18, 1  ;;  %v326_v0 = vld [vmem:[%s1116_s3] sm:$0xff] (!%p204_p10)  ;;  %v898_v1 = vmov (!%p204_p10), 0   ;;  %v327_v2 = vld [vmem:[%s1116_s3 + $0x8] sm:$0xff] (!%p204_p10)  ;;  %v328_v3 = vld [vmem:[%s1116_s3 + $0x10] sm:$0xff] (!%p204_p10)  ;;  %v899_v15 = vmov (!%p204_p10), 1   ;;  %v270_v36 = vlaneseq (!%p204_p10) }
   0xf   : > { %207 = sbr.rel (%p204_p10) target bundleno = 408 (0x198), region = 36  ;;  %812 = vset.pattern.permute.xlu1 (!%p204_p10), %v898_v1  ;;  %810 = vset.pattern.permute.xlu0 (!%p204_p10), %v898_v1  ;;  %v329_v4 = vld [vmem:[%s1116_s3 + $0x18] sm:$0xff] (!%p204_p10)  ;;  %v710_v5 = vpack.c.bf16 (!%p204_p10), %v327_v2, %v326_v0  ;;  %v330_v7 = vld [vmem:[%s1116_s3 + $0x20] sm:$0xff] (!%p204_p10)  ;;  %v331_v8 = vld [vmem:[%s1116_s3 + $0x28] sm:$0xff] (!%p204_p10)  ;;  %v900_v19 = vmov (!%p204_p10), 2   ;;  %v901_v27 = vmov (!%p204_p10), 3  }
  0x10   : > { %v714_v6 = vpack.c.bf16 (!%p204_p10), %v329_v4, %v328_v3  ;;  %v718_v11 = vpack.c.bf16 (!%p204_p10), %v331_v8, %v330_v7  ;;  %v332_v12 = vld [vmem:[%s1116_s3 + $0x30] sm:$0xff] (!%p204_p10)  ;;  %v333_v13 = vld [vmem:[%s1116_s3 + $0x38] sm:$0xff] (!%p204_p10)  ;;  %v334_v16 = vld [vmem:[%s1116_s3 + $0x40] sm:$0xff] (!%p204_p10)  ;;  %vm417_vm0 = vcmask (!%p204_p10), 195584   ;;  %v271_v39 = vand.u32 (!%p204_p10), 127, %v270_v36  ;;  %s642_s7 = sshll.u32 (!%p204_p10), %s888_s18, 8 }
  0x11   : > { %711 = vmatprep.subr.bf16.mxu1 (!%p204_p10), %v710_v5  ;;  %v722_v14 = vpack.c.bf16 (!%p204_p10), %v333_v13, %v332_v12  ;;  %v335_v17 = vld [vmem:[%s1116_s3 + $0x48] sm:$0xff] (!%p204_p10)  ;;  %v336_v20 = vld [vmem:[%s1116_s3 + $0x50] sm:$0xff] (!%p204_p10)  ;;  %v337_v21 = vld [vmem:[%s1116_s3 + $0x58] sm:$0xff] (!%p204_p10)  ;;  %v902_v42 = vmov (!%p204_p10), 0.0   ;;  %vm499_vm9 = vcmask (!%p204_p10), 261120   ;;  %s1065_s10 = scalar_lea.hbm (!%p204_p10), %s1117_s4, %s642_s7  ;;  %s903_s13 = smov (!%p204_p10), [#allocation2]  }
  0x12   : > { %713 = vmatpush3.bf16.msra.mxu1 (!%p204_p10), %v710_v5  ;;  %v726_v18 = vpack.c.bf16 (!%p204_p10), %v335_v17, %v334_v16  ;;  %v730_v22 = vpack.c.bf16 (!%p204_p10), %v337_v21, %v336_v20  ;;  %v338_v23 = vld [vmem:[%s1116_s3 + $0x60] sm:$0xff] (!%p204_p10)  ;;  %v339_v24 = vld [vmem:[%s1116_s3 + $0x68] sm:$0xff] (!%p204_p10)  ;;  %v340_v30 = vld [vmem:[%s1116_s3 + $0x70] sm:$0xff] (!%p204_p10)  ;;  %s822_s14 = sshll.u32 (!%p204_p10), %s903_s13, 4  ;;  %s823_s14 = int_to_ptr.vmem [resolvable:$false] %s822_s14 }
  0x13   : > { %715 = vmatprep.subr.bf16.mxu1 (!%p204_p10), %v714_v6  ;;  %v265_v25 = vld [vmem:[%s1115_s2] sm:$0xff] (!%p204_p10)  ;;  %v266_v26 = vld [vmem:[%s1115_s2 + $0x8] sm:$0xff] (!%p204_p10)  ;;  %v734_v29 = vpack.c.bf16 (!%p204_p10), %v339_v24, %v338_v23  ;;  %v341_v31 = vld [vmem:[%s1116_s3 + $0x78] sm:$0xff] (!%p204_p10)  ;;  %s824_s21 = scalar_lea.vmem (!%p204_p10), %s823_s14, 512 }
  0x14   : > { %v742_v28 = vpack.c.bf16 (!%p204_p10), %v266_v26, %v265_v25  ;;  %v267_v32 = vld [vmem:[%s1115_s2 + $0x10] sm:$0xff] (!%p204_p10)  ;;  %v738_v33 = vpack.c.bf16 (!%p204_p10), %v341_v31, %v340_v30 }
  0x16   : > { %s1000_s11 = scalar_select %p243_p11, %s888_s18, 1  ;;  %717 = vmatpush3.bf16.msra.mxu1 %v714_v6  ;;  %743 = vmatprep.subr.bf16.mxu0 %v742_v28 }
  0x17   : > { %719 = vmatprep.subr.bf16.mxu1 %v718_v11  ;;  %745 = vmatpush3.bf16.msra.mxu0 %v742_v28 }
  0x18   : > { %s640_s22 = sshll.u32 %s1000_s11, 4  ;;  %705 = vmatprep.subr.mxu0 %v267_v32  ;;  %s239_s11 = sand.u32 1, %s880_s16  }
  0x19   : > { %s260_s29 = scalar_lea.vmem %s1114_s1, %s640_s22  ;;  %s250_s30 = scalar_lea.vmem %s1113_s0, %s640_s22 }
  0x1a   : > { %v269_v9 = vld [vmem:[%s260_s29 + $0x8] sm:$0xff]  ;;  %v268_v10 = vld [vmem:[%s260_s29] sm:$0xff]  ;;  %721 = vmatpush3.bf16.msra.mxu1 %v718_v11  ;;  %s620_s22 = sshll.u32 %s239_s11, 4  ;;  %s1067_s12 = scalar_lea.sflag [#allocation3], %s239_s11 }
  0x1b   : > { %276 = vperm.xlu1 %812, %v269_v9   ;;  %273 = vperm.xlu0 %810, %v268_v10   ;;  %v263_v34 = vld [vmem:[%s250_s30] sm:$0xff]  ;;  %v264_v35 = vld [vmem:[%s250_s30 + $0x8] sm:$0xff]  ;;  %s241_s5 = scalar_lea.vmem [#allocation2], %s620_s22 }
  0x1c   : > { %723 = vmatprep.subr.bf16.mxu1 %v722_v14  ;;  %706 = vmatpush3.msra.mxu0 %v267_v32  ;;  %s518_s6 = sshll.u32 %s241_s5, 4  ;;  %s1060_s6 = int_to_ptr.vmem [resolvable:$true] %s518_s6 }
  0x1d   : > { %707 = vmatprep.mubr.msk.f32.mxu0 %vm417_vm0, %v263_v34  ;;  %s818_s18 = scalar_lea.vmem %s1060_s6, 256  ;;  %p825_p1 = scmp.lt.s32.totalorder %s1060_s6, %s823_s14 }
  0x1e   : > { %725 = vmatpush3.bf16.msra.mxu1 %v722_v14  ;;  %708 = vmatmul.mubr.msk.f32.vlgmr.msra.gmra.mrb[0].mxu0 %vm417_vm0, %v264_v35  ;;  %p819_p12 = scmp.ne.s32.totalorder %s1060_s6, %s818_s18  ;;  %p826_p2 = scmp.lt.s32.totalorder %s824_s21, %s818_s18 }
  0x1f   : > { %813 = vset.pattern.permute.xlu1 %v899_v15  ;;  %811 = vset.pattern.permute.xlu0 %v899_v15 }
  0x20   : > { %288 = vperm.xlu1 %813, %v269_v9   ;;  %285 = vperm.xlu0 %811, %v268_v10   ;;  %p820_p13 = pnand %p819_p12, %p971_p4  ;;  %p827_p3 = por %p826_p2, %p825_p1 }
  0x21   : > { %727 = vmatprep.subr.bf16.mxu1 %v726_v18 }
  0x22   : > { %729 = vmatpush3.bf16.msra.mxu1 %v726_v18  ;;  %p821_p0 = pneg %p820_p13 }
  0x23   : > { %731 = vmatprep.subr.bf16.mxu1 %v730_v22 }
  0x24   : > { %814 = vset.pattern.permute.xlu1 %v900_v19  ;;  %815 = vset.pattern.permute.xlu0 %v900_v19  ;;  %p828_p5 = pnand %p827_p3, %p821_p0 }
  0x25   : > { %299 = vperm.xlu1 %814, %v268_v10   ;;  %302 = vperm.xlu0 %815, %v269_v9  }
  0x26   : > { %733 = vmatpush3.bf16.msra.mxu1 %v730_v22 }
  0x27   : > { %735 = vmatprep.subr.bf16.mxu1 %v734_v29 }
  0x29   : > { %816 = vset.pattern.permute.xlu1 %v901_v27  ;;  %817 = vset.pattern.permute.xlu0 %v901_v27 }
  0x2a   : > { %313 = vperm.xlu1 %816, %v268_v10   ;;  %737 = vmatpush3.bf16.msra.mxu1 %v734_v29 }
  0x2b   : > { %739 = vmatprep.subr.bf16.mxu1 %v738_v33 }
  0x2e   : > { %316 = vperm.xlu1 %816, %v269_v9   ;;  %741 = vmatpush3.bf16.msra.mxu1 %v738_v33 }
  0x9a   : > { %v277_v37 = vpop.permute.xlu1 %276  ;;  %v274_v38 = vpop.permute.xlu0 %273 }
  0x9b   : > { %vm278_vm1 = vcmp.eq.s32.totalorder %v271_v39, %v274_v38  ;;  %vm279_vm5 = vcmp.eq.s32.totalorder %v271_v39, %v277_v37 }
  0x9c   : > { %v625_v43 = vsel %vm278_vm1, 1.0, %v902_v42  ;;  %v626_v52 = vsel %vm279_vm5, 1.0, %v902_v42 }
  0x9f   : > { %v289_v40 = vpop.permute.xlu1 %288  ;;  %v286_v41 = vpop.permute.xlu0 %285 }
  0xa0   : > { %vm290_vm2 = vcmp.eq.s32.totalorder %v271_v39, %v286_v41  ;;  %vm291_vm4 = vcmp.eq.s32.totalorder %v271_v39, %v289_v40 }
  0xa1   : > { %v627_v44 = vsel %vm290_vm2, 1.0, %v902_v42  ;;  %v628_v49 = vsel %vm291_vm4, 1.0, %v902_v42 }
  0xa2   : > { %v296_v47 = vadd.f32 %v627_v44, %v625_v43  ;;  %v297_v55 = vadd.f32 %v628_v49, %v626_v52 }
  0xa4   : > { %v300_v45 = vpop.permute.xlu1 %299  ;;  %v303_v46 = vpop.permute.xlu0 %302 }
  0xa5   : > { %vm304_vm3 = vcmp.eq.s32.totalorder %v271_v39, %v300_v45  ;;  %vm305_vm6 = vcmp.eq.s32.totalorder %v271_v39, %v303_v46 }
  0xa6   : > { %v629_v48 = vsel %vm304_vm3, 1.0, %v902_v42  ;;  %v630_v53 = vsel %vm305_vm6, 1.0, %v902_v42 }
  0xa7   : > { %v310_v51 = vadd.f32 %v629_v48, %v296_v47  ;;  %v311_v58 = vadd.f32 %v630_v53, %v297_v55 }
  0xa9   : > { %v314_v50 = vpop.permute.xlu1 %313 }
  0xaa   : > { %vm318_vm7 = vcmp.eq.s32.totalorder %v271_v39, %v314_v50 }
  0xab   : > { %v631_v54 = vsel %vm318_vm7, 1.0, %v902_v42 }
  0xac   : > { %v324_v56 = vadd.f32 %v631_v54, %v310_v51 }
  0xad   : > { %v317_v57 = vpop.permute.xlu1 %316 }
  0xae   : > { %vm319_vm8 = vcmp.eq.s32.totalorder %v271_v39, %v317_v57  ;;  %698 = vmatprep.mubr.f32.mxu1 %v324_v56 }
  0xaf   : > { %v632_v59 = vsel %vm319_vm8, 1.0, %v902_v42 }
  0xb0   : > { %v325_v60 = vadd.f32 %v632_v59, %v311_v58 }
  0xb2   : > { %699 = vmatmul.mubr.f32.vlgmr.msra.gmra.mrb[0].mxu1 %v325_v60 }
  0xf1   : > { %v709_v61 = vpop.f32.mrb[0].mxu0 }
  0xf2   : > { %v490_v62 = vpop.f32.mrb[1].mxu0 }
 0x185   : > { %v700_v63 = vpop.f32.mrb[0].mxu1 }
 0x186   : > { %v496_v0 = vadd.f32 %v709_v61, %v700_v63  ;;  %v408_v1 = vpop.f32.mrb[1].mxu1 }
 0x187   : > { %v491_v2 = vadd.f32 %v490_v62, %v408_v1 }
 0x188   : > { %501 = vst.msk [vmem:[%s241_s5 + $0x8] sm:$0xff] %vm499_vm9, %v496_v0 }
 0x189   : > { %500 = vst.msk [vmem:[%s241_s5] sm:$0xff] %vm499_vm9, %v491_v2 }
 0x18a   : > { %831 = shalt.err (!%p828_p5)
}
 0x18b   : > { %s832_s24 = scalar_lea.hbm %s1065_s10, 256  ;;  %s836_s30 = scalar_lea.hbm %s1117_s4, 512 }
 0x18c   : > { %p833_p6 = scmp.ne.s32.totalorder %s1065_s10, %s832_s24  ;;  %p837_p10 = scmp.lt.u32.totalorder %s1065_s10, %s1117_s4 }
 0x18d   : > { %p838_p11 = scmp.lt.u32.totalorder %s836_s30, %s832_s24  ;;  %p840_p13 = scmp.lt.u32.totalorder %s832_s24, %s1065_s10 }
 0x18e   : > { %p834_p7 = pnand %p833_p6, %p971_p4 }
 0x18f   : > { %p839_p12 = por %p838_p11, %p837_p10 }
 0x190   : > { %p835_p9 = pneg %p834_p7 }
 0x191   : > { %p841_p0 = por %p840_p13, %p839_p12 }
 0x193   : > { %p842_p1 = pnand %p841_p0, %p835_p9 }
 0x195   : > { %845 = shalt.err (!%p842_p1)
}
 0x196   : > { %s904_s5 = smov 128   ;;  %s905_s7 = smov 8  }
 0x197   : > { %748 = dma.vmem_to_hbm [thread:$0]  (%p971_p4), %s1060_s6, 256, %s1065_s10, %s1067_s12, %s904_s5, %s904_s5, %s905_s7  }
 0x198 PF: > { %p754_p2 = scmp.ge.s32.totalorder %s896_s20, 2  ;;  %s533_s8 = sand.u32 1, %s876_s15  }
 0x199   : > { %s534_s9 = scalar_lea.sflag [#allocation3], %s533_s8 }
 0x19a   : > { %p751_p3 = pnand %p754_p2, %p978_p8 }
 0x19c   : > { %871 = dma.done.wait (!%p751_p3), %s534_s9, 256  }
 0x19d   : > { %873 = vsyncadd (!%p751_p3), %s534_s9, 4294967040  ;;  %s17_s20 = sadd.s32 1, %s896_s20   ;;  %s1120_s15 = smov %s880_s16 }
 0x19e   : > { %p14_p5 = scmp.ge.s32.totalorder %s17_s20, 4   ;;  %s1121_s16 = smov %s884_s17 }
 0x19f   : > { %s1122_s17 = smov %s984_s28  ;;  %s1123_s18 = smov %s892_s19 }
 0x1a0   : > { %s1124_s19 = smov %s1126_s23  ;;  %16 = sbr.rel (!%p14_p5) target bundleno = 4 (0x4), region = 74 }
 0x1a7   :  { %539 = vsyncpa [#allocation3], 1 }
 0x1a8   :  { %541 = vsyncpa [#allocation3 + $0x1], 1 }

</bundles_post_ra>
